<compile_context>
chip_gen: v5e
topology: v5e:2x2
jax: 0.10.0
libtpu: 0.0.40
codegen_flags: <defaults>
</compile_context>

<pallas_src>
import functools

import jax
import jax.numpy as jnp
from jax.experimental import pallas as pl
from jax.experimental.pallas import tpu as pltpu

LANE = 128        # vreg lane width (fast axis)
SUBLANE = 8       # f32 vreg sublanes (accumulator shape)
NUM_CORES = 2     # leading "parallel" grid axis: 2 TCs on v7x, harmless on 1-TC chips


def _sublane_quantum(dtype) -> int:
    # Second-to-last block-dim quantum for a given element width.
    itemsize = jnp.dtype(dtype).itemsize
    return {4: 8, 2: 16, 1: 32}.get(itemsize, 8)


def _max_tile_rows(x_dtype, t_dtype) -> int:
    # Dtype-aware tile: keep DMA chunks >= ~1-2 MiB per operand while keeping
    # the per-step f32 working set (casts + temporaries) under the 32 MiB
    # scoped-VMEM budget (v7x-safe).
    min_itemsize = min(jnp.dtype(x_dtype).itemsize, jnp.dtype(t_dtype).itemsize)
    return 4096 if min_itemsize >= 4 else 8192


def _dice_partial_kernel(x_ref, t_ref, inter_ref, denom_ref, *,
                         rows_valid, steps_per_core, tile_rows):
    core = pl.program_id(0)   # parallel axis (TensorCore split on v7x)
    step = pl.program_id(1)   # serial reduction axis

    @pl.when(step == 0)
    def _init():
        inter_ref[...] = jnp.zeros_like(inter_ref)
        denom_ref[...] = jnp.zeros_like(denom_ref)

    # Logical first row of this tile.  It may exceed rows_valid on the ragged
    # last tile or on a core's clamped overflow steps; those rows are masked.
    row0 = (core * steps_per_core + step) * tile_rows
    row_ids = row0 + jax.lax.broadcasted_iota(jnp.int32, (tile_rows, 1), 0)
    valid = row_ids < rows_valid

    # Native-dtype DMA; cast to f32 on-tile (VPU, required on v5e); select-out
    # rows past the end of the data (their DMA contents are undefined).
    x = jnp.where(valid, x_ref[...].astype(jnp.float32), 0.0)
    t = jnp.where(valid, t_ref[...].astype(jnp.float32), 0.0)

    # Pure-VALU fold of the tile down to one (8,128) vreg per sum, accumulated
    # directly into the resident output blocks.  The single cross-lane reduce
    # happens in the wrapper on the tiny per-core partials.
    xr = x.reshape(tile_rows // SUBLANE, SUBLANE, LANE)
    tr = t.reshape(tile_rows // SUBLANE, SUBLANE, LANE)
    inter_ref[...] += jnp.sum(xr * tr, axis=0)      # partial sum(x * t)
    denom_ref[...] += jnp.sum(xr + tr, axis=0)      # partial sum(x) + sum(t), fused


@jax.jit
def dice_loss(inputs, targets, smooth=1.0):
    # torch .view(-1) semantics; keep native dtypes (no HBM-side cast).
    x = inputs.reshape(-1)
    t = targets.reshape(-1)
    n = x.shape[0]

    sub = max(_sublane_quantum(x.dtype), _sublane_quantum(t.dtype))
    max_tile_rows = _max_tile_rows(x.dtype, t.dtype)

    rows = pl.cdiv(n, LANE)                       # rows that hold real data
    rows_aligned = pl.cdiv(rows, sub) * sub

    if rows_aligned <= max_tile_rows:
        # Small input: one block; the pad below is O(tile), negligible.
        tile_rows = rows_aligned
        num_blocks = 1
        padded_rows = rows_aligned
    else:
        # Large input: fixed tiles, ragged last tile masked in-kernel.
        # No tile-multiple pad; no pad at all when n is a 128 multiple.
        tile_rows = max_tile_rows
        num_blocks = pl.cdiv(rows, tile_rows)
        padded_rows = rows

    n_padded = padded_rows * LANE
    if n_padded != n:
        # Zero padding is exact for all three sums.
        x = jnp.pad(x, (0, n_padded - n))
        t = jnp.pad(t, (0, n_padded - n))

    x2 = x.reshape(padded_rows, LANE)
    t2 = t.reshape(padded_rows, LANE)

    cores = NUM_CORES if num_blocks >= NUM_CORES else 1
    steps_per_core = pl.cdiv(num_blocks, cores)

    def in_index(c, i):
        # Clamp a core's overflow steps in-bounds; their contribution is
        # zeroed by the in-kernel row mask.
        b = jnp.minimum(c * steps_per_core + i, num_blocks - 1)
        return (b, 0)

    kernel = functools.partial(
        _dice_partial_kernel,
        rows_valid=rows, steps_per_core=steps_per_core, tile_rows=tile_rows)

    inter_p, denom_p = pl.pallas_call(
        kernel,
        out_shape=(
            jax.ShapeDtypeStruct((cores, SUBLANE, LANE), jnp.float32),  # Σ x·t partials
            jax.ShapeDtypeStruct((cores, SUBLANE, LANE), jnp.float32),  # Σ x + Σ t partials
        ),
        grid=(cores, steps_per_core),
        in_specs=[
            pl.BlockSpec((tile_rows, LANE), in_index),   # inputs
            pl.BlockSpec((tile_rows, LANE), in_index),   # targets
        ],
        out_specs=[
            pl.BlockSpec((None, SUBLANE, LANE), lambda c, i: (c, 0, 0)),
            pl.BlockSpec((None, SUBLANE, LANE), lambda c, i: (c, 0, 0)),
        ],
        compiler_params=pltpu.CompilerParams(
            dimension_semantics=("parallel", "arbitrary"),
            vmem_limit_bytes=32 * 1024 * 1024,
        ),
    )(x2, t2)

    # Tiny final reduce + dice formula on 2*cores (8,128) blocks (plain XLA).
    intersection = jnp.sum(inter_p)
    denom = jnp.sum(denom_p)
    smooth = jnp.asarray(smooth, jnp.float32)
    dice = (2.0 * intersection + smooth) / (denom + smooth)
    return 1.0 - dice


def _dice_loss_ref(inputs, targets, smooth=1.0):
    x = inputs.reshape(-1).astype(jnp.float32)
    t = targets.reshape(-1).astype(jnp.float32)
    intersection = jnp.sum(x * t)
    dice = (2.0 * intersection + smooth) / (jnp.sum(x) + jnp.sum(t) + smooth)
    return 1.0 - dice


if __name__ == "__main__":
    keys = jax.random.split(jax.random.PRNGKey(0), 8)

    # Small NCHW case (sigmoid probabilities vs. binary ground truth).
    inputs = jax.nn.sigmoid(jax.random.normal(keys[0], (2, 4, 16, 16), jnp.float32))
    targets = (jax.random.uniform(keys[1], (2, 4, 16, 16)) > 0.5).astype(jnp.float32)
    loss = dice_loss(inputs, targets)
    jax.block_until_ready(loss)
    ref = _dice_loss_ref(inputs, targets)
    assert jnp.allclose(loss, ref, atol=1e-5, rtol=1e-5), (loss, ref)

    # Narrow-dtype path (native bf16 DMA, on-tile f32 cast).
    loss_bf16 = dice_loss(inputs.astype(jnp.bfloat16), targets.astype(jnp.bfloat16))
    jax.block_until_ready(loss_bf16)
    assert jnp.allclose(loss_bf16, ref, atol=2e-2, rtol=2e-2), (loss_bf16, ref)

    # Ragged flat length (not a 128 multiple): single padded tile + row mask.
    inputs_r = jax.nn.sigmoid(jax.random.normal(keys[2], (3, 5, 6, 7), jnp.float32))
    targets_r = (jax.random.uniform(keys[3], (3, 5, 6, 7)) > 0.5).astype(jnp.float32)
    loss_r = dice_loss(inputs_r, targets_r)
    jax.block_until_ready(loss_r)
    ref_r = _dice_loss_ref(inputs_r, targets_r)
    assert jnp.allclose(loss_r, ref_r, atol=1e-5, rtol=1e-5), (loss_r, ref_r)

    # Multi-tile path: lane-aligned but NOT tile-aligned (no wrapper pad),
    # exercising the 2-way core split, the ragged last tile and the clamped
    # overflow step.
    inputs_b = jax.nn.sigmoid(jax.random.normal(keys[4], (2, 4, 400, 420), jnp.float32))
    targets_b = (jax.random.uniform(keys[5], (2, 4, 400, 420)) > 0.5).astype(jnp.float32)
    loss_b = dice_loss(inputs_b, targets_b)
    jax.block_until_ready(loss_b)
    ref_b = _dice_loss_ref(inputs_b, targets_b)
    assert jnp.allclose(loss_b, ref_b, atol=1e-4, rtol=1e-4), (loss_b, ref_b)

    print("KERNEL_OK")
</pallas_src>

<mosaic_0001>
module attributes {stable_mosaic.version = 11 : i64} {
  func.func @_dice_partial_kernel(%arg0: i32, %arg1: i32, %arg2: memref<16x128xf32, #tpu.memory_space<vmem>>, %arg3: memref<16x128xf32, #tpu.memory_space<vmem>>, %arg4: memref<1x8x128xf32, #tpu.memory_space<vmem>>, %arg5: memref<1x8x128xf32, #tpu.memory_space<vmem>>) attributes {dimension_semantics = [#tpu.dimension_semantics<parallel>, #tpu.dimension_semantics<arbitrary>], iteration_bounds = array<i64: 1, 1>, scalar_prefetch = 0 : i64, scratch_operands = 0 : i64, tpu.core_type = #tpu.core_type<tc>, window_params = [{transform_indices = @transform_0, window_bounds = array<i64: 16, 128>}, {transform_indices = @transform_1, window_bounds = array<i64: 16, 128>}, {transform_indices = @transform_2, window_bounds = array<i64: 1, 8, 128>}, {transform_indices = @transform_3, window_bounds = array<i64: 1, 8, 128>}]} {
    %c0_i32 = arith.constant 0 : i32
    %0 = arith.cmpi eq, %arg1, %c0_i32 : i32
    %1 = arith.extui %0 : i1 to i32
    %c0_i32_0 = arith.constant 0 : i32
    %2 = arith.cmpi ne, %1, %c0_i32_0 : i32
    scf.if %2 {
      %cst_20 = arith.constant 0.000000e+00 : f32
      %39 = vector.broadcast %cst_20 : f32 to vector<8x128xf32>
      %c0_21 = arith.constant 0 : index
      %c0_22 = arith.constant 0 : index
      %c0_23 = arith.constant 0 : index
      %40 = vector.load %arg4[%c0_21, %c0_22, %c0_23] : memref<1x8x128xf32, #tpu.memory_space<vmem>>, vector<1x8x128xf32>
      %41 = vector.shape_cast %40 : vector<1x8x128xf32> to vector<8x128xf32>
      %42 = vector.shape_cast %39 : vector<8x128xf32> to vector<1x8x128xf32>
      tpu.vector_store %arg4[%c0_21, %c0_22, %c0_23], %42 {strides = array<i32>} : memref<1x8x128xf32, #tpu.memory_space<vmem>>, vector<1x8x128xf32>,
      %cst_24 = arith.constant 0.000000e+00 : f32
      %43 = vector.broadcast %cst_24 : f32 to vector<8x128xf32>
      %c0_25 = arith.constant 0 : index
      %c0_26 = arith.constant 0 : index
      %c0_27 = arith.constant 0 : index
      %44 = vector.load %arg5[%c0_25, %c0_26, %c0_27] : memref<1x8x128xf32, #tpu.memory_space<vmem>>, vector<1x8x128xf32>
      %45 = vector.shape_cast %44 : vector<1x8x128xf32> to vector<8x128xf32>
      %46 = vector.shape_cast %43 : vector<8x128xf32> to vector<1x8x128xf32>
      tpu.vector_store %arg5[%c0_25, %c0_26, %c0_27], %46 {strides = array<i32>} : memref<1x8x128xf32, #tpu.memory_space<vmem>>, vector<1x8x128xf32>,
    } else {
    }
    %c1_i32 = arith.constant 1 : i32
    %3 = arith.muli %arg0, %c1_i32 : i32
    %4 = arith.addi %3, %arg1 : i32
    %c16_i32 = arith.constant 16 : i32
    %5 = arith.muli %4, %c16_i32 : i32
    %6 = tpu.iota {dimensions = array<i32: 0>} : vector<16x1xi32>
    %7 = vector.broadcast %5 : i32 to vector<16x1xi32>
    %8 = arith.addi %7, %6 : vector<16x1xi32>
    %c16_i32_1 = arith.constant 16 : i32
    %9 = vector.broadcast %c16_i32_1 : i32 to vector<16x1xi32>
    %10 = arith.cmpi slt, %8, %9 : vector<16x1xi32>
    %c0 = arith.constant 0 : index
    %c0_2 = arith.constant 0 : index
    %11 = vector.load %arg2[%c0, %c0_2] : memref<16x128xf32, #tpu.memory_space<vmem>>, vector<16x128xf32>
    %cst = arith.constant 0.000000e+00 : f32
    %12 = vector.shape_cast %10 : vector<16x1xi1> to vector<16x1xi1>
    %13 = vector.broadcast %12 : vector<16x1xi1> to vector<16x128xi1>
    %14 = vector.broadcast %cst : f32 to vector<16x128xf32>
    %15 = arith.select %13, %11, %14 : vector<16x128xi1>, vector<16x128xf32>
    %c0_3 = arith.constant 0 : index
    %c0_4 = arith.constant 0 : index
    %16 = vector.load %arg3[%c0_3, %c0_4] : memref<16x128xf32, #tpu.memory_space<vmem>>, vector<16x128xf32>
    %cst_5 = arith.constant 0.000000e+00 : f32
    %17 = vector.shape_cast %10 : vector<16x1xi1> to vector<16x1xi1>
    %18 = vector.broadcast %17 : vector<16x1xi1> to vector<16x128xi1>
    %19 = vector.broadcast %cst_5 : f32 to vector<16x128xf32>
    %20 = arith.select %18, %16, %19 : vector<16x128xi1>, vector<16x128xf32>
    %21 = vector.shape_cast %15 : vector<16x128xf32> to vector<2x8x128xf32>
    %22 = vector.shape_cast %20 : vector<16x128xf32> to vector<2x8x128xf32>
    %c0_6 = arith.constant 0 : index
    %c0_7 = arith.constant 0 : index
    %c0_8 = arith.constant 0 : index
    %23 = vector.load %arg4[%c0_6, %c0_7, %c0_8] : memref<1x8x128xf32, #tpu.memory_space<vmem>>, vector<1x8x128xf32>
    %24 = vector.shape_cast %23 : vector<1x8x128xf32> to vector<8x128xf32>
    %25 = arith.mulf %21, %22 : vector<2x8x128xf32>
    %cst_9 = arith.constant dense<0.000000e+00> : vector<8x128xf32>
    %26 = vector.multi_reduction <add>, %25, %cst_9 [0] : vector<2x8x128xf32> to vector<8x128xf32>
    %27 = arith.addf %24, %26 : vector<8x128xf32>
    %c0_10 = arith.constant 0 : index
    %c0_11 = arith.constant 0 : index
    %c0_12 = arith.constant 0 : index
    %28 = vector.load %arg4[%c0_10, %c0_11, %c0_12] : memref<1x8x128xf32, #tpu.memory_space<vmem>>, vector<1x8x128xf32>
    %29 = vector.shape_cast %28 : vector<1x8x128xf32> to vector<8x128xf32>
    %30 = vector.shape_cast %27 : vector<8x128xf32> to vector<1x8x128xf32>
    tpu.vector_store %arg4[%c0_10, %c0_11, %c0_12], %30 {strides = array<i32>} : memref<1x8x128xf32, #tpu.memory_space<vmem>>, vector<1x8x128xf32>,
    %c0_13 = arith.constant 0 : index
    %c0_14 = arith.constant 0 : index
    %c0_15 = arith.constant 0 : index
    %31 = vector.load %arg5[%c0_13, %c0_14, %c0_15] : memref<1x8x128xf32, #tpu.memory_space<vmem>>, vector<1x8x128xf32>
    %32 = vector.shape_cast %31 : vector<1x8x128xf32> to vector<8x128xf32>
    %33 = arith.addf %21, %22 : vector<2x8x128xf32>
    %cst_16 = arith.constant dense<0.000000e+00> : vector<8x128xf32>
    %34 = vector.multi_reduction <add>, %33, %cst_16 [0] : vector<2x8x128xf32> to vector<8x128xf32>
    %35 = arith.addf %32, %34 : vector<8x128xf32>
    %c0_17 = arith.constant 0 : index
    %c0_18 = arith.constant 0 : index
    %c0_19 = arith.constant 0 : index
    %36 = vector.load %arg5[%c0_17, %c0_18, %c0_19] : memref<1x8x128xf32, #tpu.memory_space<vmem>>, vector<1x8x128xf32>
    %37 = vector.shape_cast %36 : vector<1x8x128xf32> to vector<8x128xf32>
    %38 = vector.shape_cast %35 : vector<8x128xf32> to vector<1x8x128xf32>
    tpu.vector_store %arg5[%c0_17, %c0_18, %c0_19], %38 {strides = array<i32>} : memref<1x8x128xf32, #tpu.memory_space<vmem>>, vector<1x8x128xf32>,
    return
  }
  func.func @transform_0(%arg0: i32, %arg1: i32) -> (i32, i32) {
    %c1_i32 = arith.constant 1 : i32
    %0 = arith.muli %arg0, %c1_i32 : i32
    %1 = arith.addi %0, %arg1 : i32
    %c0_i32 = arith.constant 0 : i32
    %2 = arith.minsi %1, %c0_i32 : i32
    %c0_i32_0 = arith.constant 0 : i32
    %c0_i32_1 = arith.constant 0 : i32
    return %2, %c0_i32_0 : i32, i32
  }
  func.func @transform_1(%arg0: i32, %arg1: i32) -> (i32, i32) {
    %c1_i32 = arith.constant 1 : i32
    %0 = arith.muli %arg0, %c1_i32 : i32
    %1 = arith.addi %0, %arg1 : i32
    %c0_i32 = arith.constant 0 : i32
    %2 = arith.minsi %1, %c0_i32 : i32
    %c0_i32_0 = arith.constant 0 : i32
    %c0_i32_1 = arith.constant 0 : i32
    return %2, %c0_i32_0 : i32, i32
  }
  func.func @transform_2(%arg0: i32, %arg1: i32) -> (i32, i32, i32) {
    %c0_i32 = arith.constant 0 : i32
    %c0_i32_0 = arith.constant 0 : i32
    %c0_i32_1 = arith.constant 0 : i32
    return %arg0, %c0_i32, %c0_i32_0 : i32, i32, i32
  }
  func.func @transform_3(%arg0: i32, %arg1: i32) -> (i32, i32, i32) {
    %c0_i32 = arith.constant 0 : i32
    %c0_i32_0 = arith.constant 0 : i32
    %c0_i32_1 = arith.constant 0 : i32
    return %arg0, %c0_i32, %c0_i32_0 : i32, i32, i32
  }
}

</mosaic_0001>

<bundles_post_ra>
// kernel: dice_loss.1
= control target key start
LH: loop header
LB: loop body
LE: loop exit
PB: predicated region body
PF: predicated region fallthrough
CT: control target
= control target key end

     0   :  { %s176_s0 = inlined_call_operand.vmem [shape: f32[16,128], index: 0, kind: input, shape index: {}]   ;;  %s177_s1 = inlined_call_operand.vmem [shape: f32[16,128], index: 1, kind: input, shape index: {}]   ;;  %s178_s2 = inlined_call_operand.vmem [shape: f32[1,8,128], index: 2, kind: output, shape index: {0}]   ;;  %s179_s3 = inlined_call_operand.vmem [shape: f32[1,8,128], index: 3, kind: output, shape index: {1}]  }
   0x1   :  { %v93_v0 = vld [vmem:[%s176_s0] sm:$0xff]  ;;  %v94_v1 = vld [vmem:[%s176_s0 + $0x8] sm:$0xff] }
   0x2   :  { %v101_v2 = vld [vmem:[%s177_s1] sm:$0xff]  ;;  %v102_v3 = vld [vmem:[%s177_s1 + $0x8] sm:$0xff] }
   0x3   :  { %v106_v4 = vmul.f32 %v101_v2, %v93_v0  ;;  %v112_v5 = vadd.f32 %v101_v2, %v93_v0  ;;  %v107_v6 = vmul.f32 %v102_v3, %v94_v1  ;;  %v113_v7 = vadd.f32 %v102_v3, %v94_v1 }
   0x5   :  { %v108_v8 = vadd.f32 %v107_v6, %v106_v4  ;;  %v114_v9 = vadd.f32 %v113_v7, %v112_v5 }
   0x7   :  { %110 = vst [vmem:[%s178_s2] sm:$0xff] %v108_v8 }
   0x8   :  { %116 = vst [vmem:[%s179_s3] sm:$0xff] %v114_v9 }

</bundles_post_ra>
